<compile_context>
chip_gen: v7x
topology: tpu7x:2x2x1
jax: 0.10.0
libtpu: 0.0.40
codegen_flags: <defaults>
</compile_context>

<pallas_src>
import functools

import jax
import jax.numpy as jnp
from jax.experimental import pallas as pl
from jax.experimental.pallas import tpu as pltpu


def _round_up(x, m):
    return (x + m - 1) // m * m


def _masked_linear_kernel(x_ref, m_ref, w_ref, b_ref, o_ref):
    # x_ref: (tm, D)  f32 token rows (flattened over b, t, s)
    # m_ref: (tm, 1)  f32 per-row mask
    # w_ref: (D, tn)  f32 weight tile (resident when tn == H)
    # b_ref: (1, tn)  f32 bias tile
    # o_ref: (tm, tn) output tile
    y = jnp.dot(x_ref[...], w_ref[...], preferred_element_type=jnp.float32)
    y = (y + b_ref[...]) * m_ref[...]        # f32 bias add + row-mask broadcast
    o_ref[...] = y.astype(o_ref.dtype)


def _select_tiles(M, D, H):
    """Pick (tm, tn) and estimate the VMEM footprint in bytes."""
    # M tile: stream ~1 MiB of f32 x per grid step; clamp to [512, 2048];
    # sublane (8) aligned; never larger than the (rounded-up) row count.
    tm = max(512, min(2048, (1 << 20) // (4 * D)))
    tm = _round_up(tm, 8)
    tm = min(tm, _round_up(M, 8))

    # N tile: keep the whole weight resident (single block, constant index)
    # unless it is genuinely large; only then tile H lane-densely.
    w_bytes = D * H * 4
    if w_bytes <= 8 * 1024 * 1024 or H % 128 != 0:
        tn = H
    else:
        tn = 256 if H % 256 == 0 else 128   # 256-wide MXU on v6e/v7x

    def need(tm_, tn_):
        return (2 * tm_ * D * 4          # x tiles (double-buffered)
                + 2 * tm_ * 128 * 4      # mask tiles ((tm,1) lane-padded to 128)
                + 2 * tm_ * tn_ * 4      # out tiles
                + 2 * D * tn_ * 4        # W (count 2 buffers, conservative)
                + 2 * 8 * tn_ * 4)       # bias ((1,tn) sublane-padded to 8)

    # Keep the footprint within a budget that is safe on v5e/v6e/v7x.
    budget = 32 * 1024 * 1024
    while need(tm, tn) > budget and tm > 64:
        tm = max(64, _round_up(tm // 2, 8))
    return tm, tn, need(tm, tn)


@functools.partial(jax.jit, static_argnames=("out_dtype",))
def iter_over_time_mask(args, args2, w, b, *, out_dtype=None):
    """Pallas equivalent of IterOverTime_mask(masked linear)(args, args2).

    args:  (B, T, S, D) float32
    args2: (B, T, S)    mask, or None (treated as all-ones)
    w:     (D, H), b: (H,)
    returns (B, T, S, H) in `out_dtype` (default: args.dtype)
    """
    B, T, S, D = args.shape
    H = w.shape[1]
    M = B * T * S
    out_dtype = args.dtype if out_dtype is None else out_dtype

    # Flatten (free, contiguous reshape) -- no padding, no dtype pre-pass.
    x = args.reshape(M, D)
    if args2 is None:
        mask = jnp.ones((M, 1), dtype=jnp.float32)
    else:
        mask = args2.reshape(M, 1).astype(jnp.float32)
    w2 = w.astype(jnp.float32)
    b2 = b.reshape(1, H).astype(jnp.float32)

    tm, tn, need = _select_tiles(M, D, H)
    m_tiles = pl.cdiv(M, tm)

    # Only raise the scoped-VMEM limit when the tiles actually need it; cap
    # well below v7x's 64 MiB physical VMEM.
    vmem_limit = None
    if need > 16 * 1024 * 1024:
        vmem_limit = min(int(need * 5 // 4), 48 * 1024 * 1024)

    if tn == H:
        # Common case: W/bias resident in VMEM (constant block index),
        # 1-D parallel grid over M tiles.
        grid = (m_tiles,)
        in_specs = [
            pl.BlockSpec((tm, D), lambda i: (i, 0)),    # x row tile
            pl.BlockSpec((tm, 1), lambda i: (i, 0)),    # per-row mask
            pl.BlockSpec((D, H), lambda i: (0, 0)),     # resident weight
            pl.BlockSpec((1, H), lambda i: (0, 0)),     # resident bias
        ]
        out_specs = pl.BlockSpec((tm, H), lambda i: (i, 0))
        dims = ("parallel",)
    else:
        # Huge weight: tile H, with H as the OUTER grid dim so each (D, tn)
        # weight tile is DMA'd once per column block (not once per M tile).
        grid = (H // tn, m_tiles)
        in_specs = [
            pl.BlockSpec((tm, D), lambda j, i: (i, 0)),
            pl.BlockSpec((tm, 1), lambda j, i: (i, 0)),
            pl.BlockSpec((D, tn), lambda j, i: (0, j)),
            pl.BlockSpec((1, tn), lambda j, i: (0, j)),
        ]
        out_specs = pl.BlockSpec((tm, tn), lambda j, i: (i, j))
        dims = ("parallel", "parallel")

    # TODO(synk): if a v7x profile shows exposed DMA on the x/out streams,
    # bump their BlockSpecs to pipeline_mode=pl.Buffered(3).
    out = pl.pallas_call(
        _masked_linear_kernel,
        out_shape=jax.ShapeDtypeStruct((M, H), out_dtype),
        grid_spec=pltpu.PrefetchScalarGridSpec(
            num_scalar_prefetch=0,
            grid=grid,
            in_specs=in_specs,
            out_specs=out_specs,
        ),
        compiler_params=pltpu.CompilerParams(
            dimension_semantics=dims,
            vmem_limit_bytes=vmem_limit,
        ),
    )(x, mask, w2, b2)

    return out.reshape(B, T, S, H)


def _reference(args, args2, w, b):
    # Pure-JAX f32 reference of the same semantics (per-time masked linear,
    # stacked over time == flattened masked matmul).
    y = jnp.einsum("btsd,dh->btsh", args, w) + b
    if args2 is not None:
        y = y * args2[..., None]
    return y


if __name__ == "__main__":
    # Small deterministic example shapes consistent with (B, T, S, D).
    # H chosen as a 128-multiple so the stored output is lane-dense.
    B, T, S, D, H = 2, 3, 8, 32, 128

    key = jax.random.PRNGKey(0)
    k_x, k_m, k_w, k_b = jax.random.split(key, 4)

    args = jax.random.normal(k_x, (B, T, S, D), dtype=jnp.float32)
    # Binary token mask (B, T, S), like args2 in the PyTorch module.
    args2 = (jax.random.uniform(k_m, (B, T, S)) > 0.3).astype(jnp.float32)

    # Deterministic parameter init for the wrapped (masked linear) module.
    w = jax.random.normal(k_w, (D, H), dtype=jnp.float32) * 0.02
    b = jax.random.normal(k_b, (H,), dtype=jnp.float32) * 0.02

    out = iter_over_time_mask(args, args2, w, b)
    out = jax.block_until_ready(out)

    ref = _reference(args, args2, w, b)
    assert out.shape == (B, T, S, H)
    assert out.dtype == args.dtype
    # f32 data end-to-end; only MXU pass precision differs from the reference.
    assert jnp.allclose(out, ref, atol=1e-3, rtol=1e-3), "mismatch vs reference"

    print("KERNEL_OK")
</pallas_src>

<mosaic_0001>
module attributes {stable_mosaic.version = 11 : i64} {
  func.func @_masked_linear_kernel(%arg0: i32, %arg1: memref<48x32xf32, #tpu.memory_space<vmem>>, %arg2: memref<48x1xf32, #tpu.memory_space<vmem>>, %arg3: memref<32x128xf32, #tpu.memory_space<vmem>>, %arg4: memref<1x128xf32, #tpu.memory_space<vmem>>, %arg5: memref<48x128xf32, #tpu.memory_space<vmem>>) attributes {dimension_semantics = [#tpu.dimension_semantics<parallel>], iteration_bounds = array<i64: 1>, scalar_prefetch = 0 : i64, scratch_operands = 0 : i64, tpu.core_type = #tpu.core_type<tc>, window_params = [{transform_indices = @transform_0, window_bounds = array<i64: 48, 32>}, {transform_indices = @transform_1, window_bounds = array<i64: 48, 1>}, {pipeline_mode = #tpu.pipeline_mode<synchronous>, transform_indices = @transform_2, window_bounds = array<i64: 32, 128>}, {pipeline_mode = #tpu.pipeline_mode<synchronous>, transform_indices = @transform_3, window_bounds = array<i64: 1, 128>}, {transform_indices = @transform_4, window_bounds = array<i64: 48, 128>}]} {
    %c0 = arith.constant 0 : index
    %c0_0 = arith.constant 0 : index
    %0 = vector.load %arg1[%c0, %c0_0] : memref<48x32xf32, #tpu.memory_space<vmem>>, vector<48x32xf32>
    %c0_1 = arith.constant 0 : index
    %c0_2 = arith.constant 0 : index
    %1 = vector.load %arg3[%c0_1, %c0_2] : memref<32x128xf32, #tpu.memory_space<vmem>>, vector<32x128xf32>
    %cst = arith.constant dense<0.000000e+00> : vector<48x128xf32>
    %2 = tpu.matmul %0, %1, %cst {dimension_numbers = #tpu.dot_dimension_numbers<[1], [0], [0], [1], [0, 0, 1, 1], [], []>} : vector<48x32xf32>, vector<32x128xf32>, vector<48x128xf32> -> vector<48x128xf32>
    %c0_3 = arith.constant 0 : index
    %c0_4 = arith.constant 0 : index
    %3 = vector.load %arg4[%c0_3, %c0_4] : memref<1x128xf32, #tpu.memory_space<vmem>>, vector<1x128xf32>
    %4 = vector.broadcast %3 : vector<1x128xf32> to vector<48x128xf32>
    %5 = arith.addf %2, %4 : vector<48x128xf32>
    %c0_5 = arith.constant 0 : index
    %c0_6 = arith.constant 0 : index
    %6 = vector.load %arg2[%c0_5, %c0_6] : memref<48x1xf32, #tpu.memory_space<vmem>>, vector<48x1xf32>
    %7 = vector.broadcast %6 : vector<48x1xf32> to vector<48x128xf32>
    %8 = arith.mulf %5, %7 : vector<48x128xf32>
    %c0_7 = arith.constant 0 : index
    %c0_8 = arith.constant 0 : index
    %9 = vector.load %arg5[%c0_7, %c0_8] : memref<48x128xf32, #tpu.memory_space<vmem>>, vector<48x128xf32>
    tpu.vector_store %arg5[%c0_7, %c0_8], %8 {strides = array<i32>} : memref<48x128xf32, #tpu.memory_space<vmem>>, vector<48x128xf32>,
    return
  }
  func.func @transform_0(%arg0: i32) -> (i32, i32) {
    %c0_i32 = arith.constant 0 : i32
    %c0_i32_0 = arith.constant 0 : i32
    return %arg0, %c0_i32 : i32, i32
  }
  func.func @transform_1(%arg0: i32) -> (i32, i32) {
    %c0_i32 = arith.constant 0 : i32
    %c0_i32_0 = arith.constant 0 : i32
    return %arg0, %c0_i32 : i32, i32
  }
  func.func @transform_2(%arg0: i32) -> (i32, i32) {
    %c0_i32 = arith.constant 0 : i32
    %c0_i32_0 = arith.constant 0 : i32
    %c0_i32_1 = arith.constant 0 : i32
    return %c0_i32, %c0_i32_0 : i32, i32
  }
  func.func @transform_3(%arg0: i32) -> (i32, i32) {
    %c0_i32 = arith.constant 0 : i32
    %c0_i32_0 = arith.constant 0 : i32
    %c0_i32_1 = arith.constant 0 : i32
    return %c0_i32, %c0_i32_0 : i32, i32
  }
  func.func @transform_4(%arg0: i32) -> (i32, i32) {
    %c0_i32 = arith.constant 0 : i32
    %c0_i32_0 = arith.constant 0 : i32
    return %arg0, %c0_i32 : i32, i32
  }
}

</mosaic_0001>

<bundles_post_ra>
// kernel: iter_over_time_mask.1
= control target key start
LH: loop header
LB: loop body
LE: loop exit
PB: predicated region body
PF: predicated region fallthrough
CT: control target
= control target key end

     0   :  { %vm35_vm0 = vcmask 261120   ;;  %v289_v7 = vmov 0   ;;  %s387_s0 = inlined_call_operand.vmem [shape: f32[48,32], index: 0, kind: input, shape index: {}]   ;;  %s388_s1 = inlined_call_operand.vmem [shape: f32[48,1], index: 1, kind: input, shape index: {}]   ;;  %s389_s2 = inlined_call_operand.vmem [shape: f32[32,128], index: 2, kind: input, shape index: {}]   ;;  %s390_s3 = inlined_call_operand.vmem [shape: f32[1,128], index: 3, kind: input, shape index: {}]   ;;  %s391_s4 = inlined_call_operand.hbm [shape: f32[48,128], index: 4, kind: output, shape index: {}]  }
   0x1   :  { %v24_v0 = vld [vmem:[%s389_s2] sm:$0xff]  ;;  %v25_v1 = vld [vmem:[%s389_s2 + $0x8] sm:$0xff]  ;;  %v26_v2 = vld [vmem:[%s389_s2 + $0x10] sm:$0xff]  ;;  %264 = vset.pattern.permute.xlu1 %v289_v7  ;;  %263 = vset.pattern.permute.xlu0 %v289_v7 }
   0x2   :  { %v247_v3 = vpack.c.bf16 %v25_v1, %v24_v0  ;;  %v27_v4 = vld [vmem:[%s389_s2 + $0x18] sm:$0xff]  ;;  %v18_v5 = vld [vmem:[%s387_s0] sm:$0xff]  ;;  %v20_v6 = vld [vmem:[%s387_s0 + $0x10] sm:$0xff] }
   0x3   :  { %v251_v8 = vpack.c.bf16 %v27_v4, %v26_v2  ;;  %238 = vmatprep.mubr.msk.f32.mxu0 %vm35_vm0, %v18_v5  ;;  %241 = vmatprep.mubr.msk.f32.mxu1 %vm35_vm0, %v20_v6  ;;  %v151_v9 = vld [vmem:[%s388_s1 + $0x10] sm:$0xff]  ;;  %v149_v10 = vld [vmem:[%s388_s1] sm:$0xff] }
   0x4   :  { %248 = vmatprep.subr.bf16.mxu0 %v247_v3  ;;  %255 = vmatprep.subr.bf16.mxu1 %v247_v3 }
   0x5   :  { %250 = vmatpush3.bf16.msra.mxu0 %v247_v3  ;;  %257 = vmatpush3.bf16.msra.mxu1 %v247_v3 }
   0x6   :  { %252 = vmatprep.subr.bf16.mxu0 %v251_v8  ;;  %256 = vmatprep.subr.bf16.mxu1 %v251_v8 }
   0x7   :  { %9 = vsyncpa [#allocation3], 0  ;;  %167 = vperm.xlu1 %264, %v151_v9   ;;  %157 = vperm.xlu0 %263, %v149_v10   ;;  %v152_v11 = vld [vmem:[%s388_s1 + $0x18] sm:$0xff]  ;;  %v150_v12 = vld [vmem:[%s388_s1 + $0x8] sm:$0xff] }
   0x8   :  { %v19_v13 = vld [vmem:[%s387_s0 + $0x8] sm:$0xff]  ;;  %v21_v14 = vld [vmem:[%s387_s0 + $0x18] sm:$0xff]  ;;  %v22_v15 = vld [vmem:[%s387_s0 + $0x20] sm:$0xff] }
   0x9   :  { %254 = vmatpush3.bf16.msra.mxu0 %v251_v8  ;;  %258 = vmatpush3.bf16.msra.mxu1 %v251_v8  ;;  %v154_v16 = vld [vmem:[%s388_s1 + $0x28] sm:$0xff]  ;;  %v153_v17 = vld [vmem:[%s388_s1 + $0x20] sm:$0xff] }
   0xa   :  { %v23_v18 = vld [vmem:[%s387_s0 + $0x28] sm:$0xff]  ;;  %v213_v21 = vld [vmem:[%s390_s3] ss:$0 sm:$0xff]  ;;  %s290_s0 = smov [#allocation2]  }
   0xb   :  { %172 = vperm.xlu1 %264, %v152_v11   ;;  %162 = vperm.xlu0 %263, %v150_v12   ;;  %s202_s1 = sshll.u32 %s290_s0, 4  ;;  %s203_s1 = int_to_ptr.vmem [resolvable:$true] %s202_s1 }
   0xc   :  { %239 = vmatmul.mubr.msk.f32.vlgmr.msra.gmra.mrb[0].mxu0 %vm35_vm0, %v19_v13  ;;  %242 = vmatmul.mubr.msk.f32.vlgmr.msra.gmra.mrb[0].mxu1 %vm35_vm0, %v21_v14  ;;  %s265_s3 = scalar_lea.vmem %s203_s1, 768  ;;  %p270_p1 = scmp.lt.s32.totalorder %s203_s1, %s203_s1 }
   0xd   :  { %244 = vmatprep.mubr.msk.f32.mxu1 %vm35_vm0, %v22_v15  ;;  %p266_p0 = scmp.ne.s32.totalorder %s203_s1, %s265_s3  ;;  %p271_p2 = scmp.lt.s32.totalorder %s265_s3, %s265_s3 }
   0xf   :  { %182 = vperm.xlu1 %264, %v154_v16   ;;  %177 = vperm.xlu0 %263, %v153_v17   ;;  %p272_p3 = por %p271_p2, %p270_p1 }
  0x10   :  { %245 = vmatmul.mubr.msk.f32.gmra.mrb[2].mxu1 %vm35_vm0, %v23_v18 }
  0x11   :  { %p273_p4 = pnand %p272_p3, %p266_p0 }
  0x86   :  { %v168_v19 = vpop.permute.xlu1 %167  ;;  %v158_v20 = vpop.permute.xlu0 %157 }
  0x8a   :  { %v173_v22 = vpop.permute.xlu1 %172  ;;  %v163_v23 = vpop.permute.xlu0 %162 }
  0x8e   :  { %v183_v39 = vpop.permute.xlu1 %182  ;;  %v178_v41 = vpop.permute.xlu0 %177 }
  0xdf   :  { %v240_v24 = vpop.f32.mrb[0].mxu0  ;;  %v243_v25 = vpop.f32.mrb[0].mxu1 }
  0xe0   :  { %v126_v26 = vadd.f32 %v240_v24, %v213_v21  ;;  %v136_v27 = vadd.f32 %v243_v25, %v213_v21  ;;  %v120_v28 = vpop.f32.mrb[1].mxu0  ;;  %v130_v29 = vpop.f32.mrb[1].mxu1 }
  0xe1   :  { %v121_v30 = vadd.f32 %v213_v21, %v120_v28  ;;  %v131_v31 = vadd.f32 %v213_v21, %v130_v29 }
  0xe2   :  { %v186_v32 = vmul.f32 %v163_v23, %v126_v26  ;;  %v188_v33 = vmul.f32 %v173_v22, %v136_v27 }
  0xe3   :  { %v185_v34 = vmul.f32 %v158_v20, %v121_v30  ;;  %v187_v35 = vmul.f32 %v168_v19, %v131_v31  ;;  %v246_v36 = vpop.f32.mrb[2].mxu1 }
  0xe4   :  { %192 = vst [vmem:[#allocation2 + $0x8] sm:$0xff] %v186_v32  ;;  %194 = vst [vmem:[#allocation2 + $0x18] sm:$0xff] %v188_v33  ;;  %v146_v37 = vadd.f32 %v246_v36, %v213_v21  ;;  %v140_v38 = vpop.f32.mrb[3].mxu1 }
  0xe5   :  { %191 = vst [vmem:[#allocation2] sm:$0xff] %v185_v34  ;;  %193 = vst [vmem:[#allocation2 + $0x10] sm:$0xff] %v187_v35  ;;  %v141_v40 = vadd.f32 %v213_v21, %v140_v38 }
  0xe6   :  { %v190_v42 = vmul.f32 %v183_v39, %v146_v37 }
  0xe7   :  { %v189_v43 = vmul.f32 %v178_v41, %v141_v40 }
  0xe8   :  { %196 = vst [vmem:[#allocation2 + $0x28] sm:$0xff] %v190_v42 }
  0xe9   :  { %195 = vst [vmem:[#allocation2 + $0x20] sm:$0xff] %v189_v43 }
  0xea   :  { %276 = shalt.err (!%p273_p4)
}
  0xeb   :  { %s277_s24 = scalar_lea.hbm %s391_s4, 768 }
  0xec   :  { %p278_p5 = scmp.ne.s32.totalorder %s391_s4, %s277_s24  ;;  %p281_p6 = scmp.lt.u32.totalorder %s277_s24, %s391_s4 }
  0xee   :  { %p283_p7 = pnand %p281_p6, %p278_p5 }
  0xf0   :  { %286 = shalt.err (!%p283_p7)
}
  0xf1   :  { %s291_s28 = smov 128   ;;  %s292_s29 = smov 8  }
  0xf2   :  { %208 = dma.vmem_to_hbm [thread:$0]  %s203_s1, 768, %s391_s4, [#allocation3], %s291_s28, %s291_s28, %s292_s29  }
  0xf3   :  { %287 = dma.done.wait [#allocation3], 768  }
  0xf4   :  { %288 = vsyncadd [#allocation3], 4294966528 }
  0xf5   :  { %212 = vsyncpa [#allocation3], 1 }

</bundles_post_ra>
